<compile_context>
chip_gen: v6e
topology: v6e:2x2x1
jax: 0.10.0
libtpu: 0.0.40
codegen_flags: <defaults>
</compile_context>

<pallas_src>
import functools

import jax
import jax.numpy as jnp
from jax import lax
from jax.experimental import pallas as pl
from jax.experimental.pallas import tpu as pltpu


def _round_up(x, m):
    return (x + m - 1) // m * m


def _pick_tile(dim, align, cap):
    """Tile size: multiple of `align`; single block if the aligned dim fits `cap`.

    Otherwise prefer tiles that keep padding minimal while penalizing small
    tiles (small tiles raise HBM re-reads of the other operand and per-step
    overhead).
    """
    dim_al = _round_up(dim, align)
    if dim_al <= cap:
        return dim_al                        # single block: alignment-only padding
    best_t, best_cost = align, None
    for t in range(align, cap + 1, align):
        padded = _round_up(dim, t)
        cost = padded * (1.0 + 256.0 / t)    # padded work + small-tile penalty
        if best_cost is None or cost < best_cost or (cost == best_cost and t > best_t):
            best_t, best_cost = t, cost
    return best_t


def _device_config():
    """(use_int8_mxu, tm_cap, tn_cap, tk_cap, vmem_limit_bytes) for this chip."""
    try:
        kind = jax.devices()[0].device_kind.lower().replace(" ", "")
    except Exception:
        kind = ""
    is_v7 = ("v7" in kind) or ("7x" in kind)
    if is_v7:
        # v7x: no integer MXU path; 64 MiB VMEM per TC -> keep tk <= 1024 and a
        # conservative scoped-VMEM request.
        return False, 512, 512, 1024, 32 * 1024 * 1024
    # v4 / v5e / v6e: int8 MXU, 128 MiB VMEM (v5e scoped default is only 16 MiB,
    # so raise it explicitly).
    return True, 512, 512, 2048, 64 * 1024 * 1024


def _dot_s8_nt(a_ref, b_ref, *, use_int8):
    """int32[tm, tn] = a(int8[1,tm,tk]) @ b(int8[1,tn,tk])^T, bit-exact."""
    _, tm, tk = a_ref.shape
    tn = b_ref.shape[1]
    dnums = (((1,), (1,)), ((), ()))         # contract last dims (NT matmul)

    if use_int8:
        return lax.dot_general(a_ref[0], b_ref[0], dimension_numbers=dnums,
                               preferred_element_type=jnp.int32)

    # v7x fallback: MXU has no integer path, so feed bf16 (exact for int8).
    # Chunk K so (a) cast temporaries stay small (no vreg spills stealing the
    # store slot) and (b) each f32 partial sum is < 2^24 and exact; cast each
    # chunk result to int32 before accumulating -> bit-exact for any K.
    k_chunk = 256 if tk % 256 == 0 else 128
    n_chunks = tk // k_chunk

    def chunk_dot(start):
        a_c = a_ref[0, :, pl.ds(start, k_chunk)].astype(jnp.bfloat16)
        b_c = b_ref[0, :, pl.ds(start, k_chunk)].astype(jnp.bfloat16)
        part = lax.dot_general(a_c, b_c, dimension_numbers=dnums,
                               preferred_element_type=jnp.float32)
        return part.astype(jnp.int32)

    if n_chunks == 1:
        return chunk_dot(0)

    def body(c, acc):
        return acc + chunk_dot(pl.multiple_of(c * k_chunk, k_chunk))

    return lax.fori_loop(0, n_chunks, body, jnp.zeros((tm, tn), jnp.int32),
                         unroll=True)


def _bmm_kernel_multik(alpha_ref, a_ref, b_ref, o_ref, acc_ref, *, use_int8):
    k = pl.program_id(3)

    @pl.when(k == 0)
    def _():
        acc_ref[...] = jnp.zeros_like(acc_ref)

    acc_ref[...] += _dot_s8_nt(a_ref, b_ref, use_int8=use_int8)

    @pl.when(k == pl.num_programs(3) - 1)
    def _():
        o_ref[0] = (alpha_ref[0] * acc_ref[...].astype(jnp.float32)).astype(o_ref.dtype)


def _bmm_kernel_singlek(alpha_ref, a_ref, b_ref, o_ref, *, use_int8):
    # Whole K fits one tile: no accumulator scratch, no init/finalize gates.
    acc = _dot_s8_nt(a_ref, b_ref, use_int8=use_int8)
    o_ref[0] = (alpha_ref[0] * acc.astype(jnp.float32)).astype(o_ref.dtype)


@functools.partial(
    jax.jit,
    static_argnames=("out_dtype", "use_int8", "tm_cap", "tn_cap", "tk_cap",
                     "vmem_limit"))
def _bmm_s8t_s8n_f32t_impl(a, b, alpha_arr, *, out_dtype, use_int8,
                           tm_cap, tn_cap, tk_cap, vmem_limit):
    B, M, K = a.shape
    _, N, _ = b.shape

    # tm multiple of 32 (int8 sublane packing); tn / tk multiples of 128
    # (lane dims -> lane-dense f32 output stores); padding kept near minimum.
    tm = _pick_tile(M, 32, tm_cap)
    tn = _pick_tile(N, 128, tn_cap)
    tk = _pick_tile(K, 128, tk_cap)
    Mp, Np, Kp = _round_up(M, tm), _round_up(N, tn), _round_up(K, tk)

    if (Mp, Kp) != (M, K):
        a = jnp.pad(a, ((0, 0), (0, Mp - M), (0, Kp - K)))
    if (Np, Kp) != (N, K):
        b = jnp.pad(b, ((0, 0), (0, Np - N), (0, Kp - K)))

    nm, nn, nk = Mp // tm, Np // tn, Kp // tk

    # Advisory cost: padded dims, operand re-reads (A read nn times, B read nm
    # times), f32 output.
    cost = pl.CostEstimate(
        flops=2 * B * Mp * Np * Kp,
        transcendentals=0,
        bytes_accessed=B * Mp * Kp * nn + B * Np * Kp * nm + 4 * B * Mp * Np)

    # TODO(synk): if xprof shows the kernel DMA-exposed on a given shape, add
    # pipeline_mode=pl.Buffered(3) to the A/B in_specs below.
    if nk == 1:
        grid_spec = pltpu.PrefetchScalarGridSpec(
            num_scalar_prefetch=1,           # alpha lives in SMEM
            grid=(B, nm, nn),
            in_specs=[
                pl.BlockSpec((1, tm, tk), lambda bi, mi, ni, alpha: (bi, mi, 0)),
                pl.BlockSpec((1, tn, tk), lambda bi, mi, ni, alpha: (bi, ni, 0)),
            ],
            out_specs=pl.BlockSpec((1, tm, tn),
                                   lambda bi, mi, ni, alpha: (bi, mi, ni)),
            scratch_shapes=[],
        )
        kernel = functools.partial(_bmm_kernel_singlek, use_int8=use_int8)
        dim_sem = ("parallel", "parallel", "parallel")
    else:
        grid_spec = pltpu.PrefetchScalarGridSpec(
            num_scalar_prefetch=1,
            grid=(B, nm, nn, nk),            # K trailing -> accumulator resident
            in_specs=[
                pl.BlockSpec((1, tm, tk), lambda bi, mi, ni, ki, alpha: (bi, mi, ki)),
                pl.BlockSpec((1, tn, tk), lambda bi, mi, ni, ki, alpha: (bi, ni, ki)),
            ],
            out_specs=pl.BlockSpec((1, tm, tn),
                                   lambda bi, mi, ni, ki, alpha: (bi, mi, ni)),
            scratch_shapes=[pltpu.VMEM((tm, tn), jnp.int32)],
        )
        kernel = functools.partial(_bmm_kernel_multik, use_int8=use_int8)
        dim_sem = ("parallel", "parallel", "parallel", "arbitrary")

    out = pl.pallas_call(
        kernel,
        out_shape=jax.ShapeDtypeStruct((B, Mp, Np), out_dtype),
        grid_spec=grid_spec,
        compiler_params=pltpu.CompilerParams(
            dimension_semantics=dim_sem,
            vmem_limit_bytes=vmem_limit),
        cost_estimate=cost,
    )(alpha_arr, a, b)

    if (Mp, Np) != (M, N):
        out = out[:, :M, :N]
    return out


def bmm_s8t_s8n_f32t(a, b, alpha, out_dtype=jnp.float32):
    assert a.dtype == jnp.int8 and b.dtype == jnp.int8
    assert a.shape[0] == b.shape[0] and a.shape[2] == b.shape[2]
    use_int8, tm_cap, tn_cap, tk_cap, vmem_limit = _device_config()
    alpha_arr = jnp.asarray(alpha, jnp.float32).reshape((1,))
    return _bmm_s8t_s8n_f32t_impl(
        a, b, alpha_arr,
        out_dtype=jnp.dtype(out_dtype), use_int8=use_int8,
        tm_cap=tm_cap, tn_cap=tn_cap, tk_cap=tk_cap, vmem_limit=vmem_limit)


class BMM_S8T_S8N_F32T:
    """JAX mirror of the PyTorch module (alpha buffer + forward)."""

    def __init__(self, alpha, dtype=jnp.float32):
        self.a = jnp.asarray(alpha, jnp.float32)
        self.dtype = dtype

    def __call__(self, a, b):
        return bmm_s8t_s8n_f32t(a, b, self.a, out_dtype=self.dtype)

    @staticmethod
    def from_scale(a_scale, b_scale, dtype=jnp.float32):
        mod = BMM_S8T_S8N_F32T(1.0, dtype=dtype)
        mod.a = jnp.asarray(a_scale, jnp.float32) * jnp.asarray(b_scale, jnp.float32)
        return mod


if __name__ == "__main__":
    key = jax.random.PRNGKey(0)
    k_a, k_b = jax.random.split(key)

    B, M, N, K = 2, 16, 16, 32
    a = jax.random.randint(k_a, (B, M, K), -128, 128, dtype=jnp.int32).astype(jnp.int8)
    b = jax.random.randint(k_b, (B, N, K), -128, 128, dtype=jnp.int32).astype(jnp.int8)

    # Deterministic "parameter": alpha = a_scale * b_scale
    module = BMM_S8T_S8N_F32T.from_scale(0.02, 0.015)

    out = module(a, b)
    out = jax.block_until_ready(out)

    # Reference in plain JAX (exact int32 accumulation).
    ref = (module.a * jnp.einsum(
        "bmk,bnk->bmn", a.astype(jnp.int32), b.astype(jnp.int32)
    ).astype(jnp.float32)).astype(jnp.float32)

    assert out.shape == (B, M, N) and out.dtype == jnp.float32
    assert jnp.allclose(out, ref, rtol=1e-5, atol=1e-5), "mismatch vs reference"

    print("KERNEL_OK")
</pallas_src>

<mosaic_0001>
module attributes {stable_mosaic.version = 11 : i64} {
  func.func @_bmm_kernel_singlek(%arg0: i32, %arg1: i32, %arg2: i32, %arg3: memref<1xf32, #tpu.memory_space<smem>>, %arg4: memref<1x32x128xi8, #tpu.memory_space<vmem>>, %arg5: memref<1x128x128xi8, #tpu.memory_space<vmem>>, %arg6: memref<1x32x128xf32, #tpu.memory_space<vmem>>) attributes {dimension_semantics = [#tpu.dimension_semantics<parallel>, #tpu.dimension_semantics<parallel>, #tpu.dimension_semantics<parallel>], iteration_bounds = array<i64: 2, 1, 1>, scalar_prefetch = 1 : i64, scratch_operands = 0 : i64, tpu.core_type = #tpu.core_type<tc>, window_params = [{transform_indices = @transform_0, window_bounds = array<i64: 1, 32, 128>}, {transform_indices = @transform_1, window_bounds = array<i64: 1, 128, 128>}, {transform_indices = @transform_2, window_bounds = array<i64: 1, 32, 128>}]} {
    %c0 = arith.constant 0 : index
    %c0_0 = arith.constant 0 : index
    %c0_1 = arith.constant 0 : index
    %0 = vector.load %arg4[%c0, %c0_0, %c0_1] : memref<1x32x128xi8, #tpu.memory_space<vmem>>, vector<1x32x128xi8>
    %1 = vector.shape_cast %0 : vector<1x32x128xi8> to vector<32x128xi8>
    %c0_2 = arith.constant 0 : index
    %c0_3 = arith.constant 0 : index
    %c0_4 = arith.constant 0 : index
    %2 = vector.load %arg5[%c0_2, %c0_3, %c0_4] : memref<1x128x128xi8, #tpu.memory_space<vmem>>, vector<1x128x128xi8>
    %3 = vector.shape_cast %2 : vector<1x128x128xi8> to vector<128x128xi8>
    %cst = arith.constant dense<0> : vector<32x128xi32>
    %4 = tpu.matmul %1, %3, %cst {dimension_numbers = #tpu.dot_dimension_numbers<[1], [1], [0], [0], [0, 0, 1, 0], [], []>} : vector<32x128xi8>, vector<128x128xi8>, vector<32x128xi32> -> vector<32x128xi32>
    %c0_5 = arith.constant 0 : index
    %5 = memref.load %arg3[%c0_5] : memref<1xf32, #tpu.memory_space<smem>>
    %6 = arith.sitofp %4 : vector<32x128xi32> to vector<32x128xf32>
    %7 = vector.broadcast %5 : f32 to vector<32x128xf32>
    %8 = arith.mulf %7, %6 : vector<32x128xf32>
    %c0_6 = arith.constant 0 : index
    %c0_7 = arith.constant 0 : index
    %c0_8 = arith.constant 0 : index
    %9 = vector.load %arg6[%c0_6, %c0_7, %c0_8] : memref<1x32x128xf32, #tpu.memory_space<vmem>>, vector<1x32x128xf32>
    %10 = vector.shape_cast %9 : vector<1x32x128xf32> to vector<32x128xf32>
    %11 = vector.shape_cast %8 : vector<32x128xf32> to vector<1x32x128xf32>
    tpu.vector_store %arg6[%c0_6, %c0_7, %c0_8], %11 {strides = array<i32>} : memref<1x32x128xf32, #tpu.memory_space<vmem>>, vector<1x32x128xf32>,
    return
  }
  func.func @transform_0(%arg0: i32, %arg1: i32, %arg2: i32, %arg3: memref<1xf32, #tpu.memory_space<smem>>) -> (i32, i32, i32) {
    %c0_i32 = arith.constant 0 : i32
    %c0_i32_0 = arith.constant 0 : i32
    return %arg0, %arg1, %c0_i32 : i32, i32, i32
  }
  func.func @transform_1(%arg0: i32, %arg1: i32, %arg2: i32, %arg3: memref<1xf32, #tpu.memory_space<smem>>) -> (i32, i32, i32) {
    %c0_i32 = arith.constant 0 : i32
    %c0_i32_0 = arith.constant 0 : i32
    return %arg0, %arg2, %c0_i32 : i32, i32, i32
  }
  func.func @transform_2(%arg0: i32, %arg1: i32, %arg2: i32, %arg3: memref<1xf32, #tpu.memory_space<smem>>) -> (i32, i32, i32) {
    %c0_i32 = arith.constant 0 : i32
    return %arg0, %arg1, %arg2 : i32, i32, i32
  }
}

</mosaic_0001>

<bundles_post_ra>
// kernel: _bmm_s8t_s8n_f32t_impl.1
= control target key start
LH: loop header
LB: loop body
LE: loop exit
PB: predicated region body
PF: predicated region fallthrough
CT: control target
= control target key end

     0   :  { %s502_s14 = smov 0   ;;  %s504_s15 = smov 0   ;;  %s538_s0 = inlined_call_operand.<no memory space> [shape: f32[1], index: 0, kind: input, shape index: {}]   ;;  %s539_s1 = inlined_call_operand.vmem [shape: s8[2,32,128], index: 1, kind: input, shape index: {}]   ;;  %s540_s2 = inlined_call_operand.vmem [shape: s8[2,128,128], index: 2, kind: input, shape index: {}]   ;;  %s541_s3 = inlined_call_operand.vmem [shape: f32[2,32,128], index: 3, kind: output, shape index: {}]  }
   0x1   :  { %8 = sst [smem:[#allocation3]] %s538_s0  ;;  %s506_s16 = smov 0  }
   0x2 LB: > { %s33_s0 = sadd.s32 1, %s471_s15  ;;  %p398_p0 = scmp.ge.s32.totalorder %s475_s16, 1  ;;  %s475_s16 = sphi %s506_s16, %s14_s16   ;;  %s471_s15 = sphi %s504_s15, %s543_s15   ;;  %s467_s14 = sphi %s502_s14, %s542_s14  }
   0x3   : > { %p35_p1 = scmp.ge.s32.totalorder %s33_s0, 2  ;;  %p158_p2 = scmp.lt.s32.totalorder %s475_s16, 3 }
   0x5   : > { %s545_s0 = smov (%p35_p1, %s33_s0), 0  ;;  %p159_p3 = pnand %p398_p0, %p158_p2 }
   0x6   : > { %p198_p4 = scmp.lt.s32.totalorder (!%p159_p3), %s467_s14, 1  ;;  %s265_s25 = sld [smem:[#allocation3]] (!%p159_p3) }
   0x7   : > { %162 = sbr.rel (%p159_p3) target bundleno = 241 (0xf1), region = 28 }
   0xc   : > { %v477_v0 = vmov 0.0   ;;  %vm478_vm0 = vmmov 0   ;;  %s547_s14 = smov (!%p198_p4, %s467_s14), 1  ;;  %v270_v7 = vstv %s265_s25 }
   0xd   : > { %413 = vmatprep.subr.s8.mxu0 %v477_v0  ;;  %421 = vmatprep.mubr.msk.s8.mxu0 %vm478_vm0, %v477_v0  ;;  %s406_s17 = sshll.u32 %s547_s14, 5  ;;  %s399_s21 = sshll.u32 %s547_s14, 3 }
   0xe   : > { %s213_s20 = scalar_lea.vmem %s540_s2, %s406_s17  ;;  %s204_s24 = scalar_lea.vmem %s539_s1, %s399_s21 }
   0xf   : > { %v233_v1 = vld [vmem:[%s213_s20 + $0x18] sm:$0xff]  ;;  %v232_v2 = vld [vmem:[%s213_s20 + $0x10] sm:$0xff]  ;;  %v231_v3 = vld [vmem:[%s213_s20 + $0x8] sm:$0xff]  ;;  %s226_s28 = scalar_lea.vmem %s541_s3, %s406_s17 }
  0x10   : > { %414 = vmatpush3.s8.xpose.msra.mxu0 %v233_v1  ;;  %v230_v4 = vld [vmem:[%s213_s20] sm:$0xff] }
  0x11   : > { %415 = vmatprep.subr.s8.mxu0 %v477_v0  ;;  %v229_v5 = vld [vmem:[%s204_s24] sm:$0xff] }
  0x18   : > { %416 = vmatpush3.s8.xpose.msra.mxu0 %v232_v2 }
  0x19   : > { %417 = vmatprep.subr.s8.mxu0 %v477_v0 }
  0x20   : > { %418 = vmatpush3.s8.xpose.msra.mxu0 %v231_v3 }
  0x21   : > { %419 = vmatprep.subr.s8.mxu0 %v477_v0 }
  0x28   : > { %420 = vmatpush3.s8.xpose.msra.mxu0 %v230_v4 }
  0x2f   : > { %422 = vmatmul.mubr.s8.vlgmr.msra.gmra.mxu0 %v229_v5 }
  0xe5   : > { %v252_v6 = vpop.s32.mrf.mxu0 }
  0xe6   : > { %v266_v8 = vcvt.s32.f32 %v252_v6  ;;  %v423_v9 = vpop.s32.mrf.mxu0 }
  0xe7   : > { %v255_v10 = vpop.s32.mrf.mxu0 }
  0xe8   : > { %v271_v11 = vmul.f32 %v270_v7, %v266_v8  ;;  %v267_v12 = vcvt.s32.f32 %v255_v10  ;;  %v424_v13 = vpop.s32.mrf.mxu0 }
  0xe9   : > { %v258_v14 = vpop.s32.mrf.mxu0 }
  0xea   : > { %275 = vst [vmem:[%s226_s28] sm:$0xff] %v271_v11  ;;  %v272_v15 = vmul.f32 %v270_v7, %v267_v12  ;;  %v268_v16 = vcvt.s32.f32 %v258_v14  ;;  %v425_v17 = vpop.s32.mrf.mxu0 }
  0xeb   : > { %v261_v18 = vpop.s32.mrf.mxu0 }
  0xec   : > { %276 = vst [vmem:[%s226_s28 + $0x8] sm:$0xff] %v272_v15  ;;  %v273_v19 = vmul.f32 %v270_v7, %v268_v16  ;;  %v269_v20 = vcvt.s32.f32 %v261_v18  ;;  %v426_v21 = vpop.s32.mrf.mxu0 }
  0xee   : > { %277 = vst [vmem:[%s226_s28 + $0x10] sm:$0xff] %v273_v19  ;;  %v274_v22 = vmul.f32 %v270_v7, %v269_v20 }
  0xf0   : > { %278 = vst [vmem:[%s226_s28 + $0x18] sm:$0xff] %v274_v22 }
  0xf1 PF: > { %s14_s16 = sadd.s32 1, %s475_s16   ;;  %s542_s14 = smov %s471_s15 }
  0xf2   : > { %p11_p5 = scmp.ge.s32.totalorder %s14_s16, 4   ;;  %s543_s15 = smov %s545_s0 }
  0xf4   :  { %13 = sbr.rel (!%p11_p5) target bundleno = 2 (0x2), region = 61 }

</bundles_post_ra>
